<compile_context>
chip_gen: v7x
topology: tpu7x:2x2x1
jax: 0.10.0
libtpu: 0.0.40
codegen_flags: <defaults>
</compile_context>

<pallas_src>
import jax
import jax.numpy as jnp
from jax.experimental import pallas as pl
from jax.experimental.pallas import tpu as pltpu

SCALE = 20.0
HYPER_RATIO = 0.01


def mnr_hyper_loss_kernel(a_ref, b_ref, c_ref, mnr_ref, hyp_ref,
                          m_sc, l_sc, d_sc):
    i = pl.program_id(0)            # anchor-row (B) block
    j = pl.program_id(1)            # candidate (N) block -- reduction axis
    nj = pl.num_programs(1)

    a = a_ref[...].astype(jnp.float32)     # (tb, D)
    b = b_ref[...].astype(jnp.float32)     # (tn, D)

    # util.cos_sim: F.normalize rows with eps=1e-12 on the norm
    # (== 1e-24 clamp on the squared norm).
    a_sq = jnp.sum(a * a, axis=-1, keepdims=True)           # (tb, 1)
    b_sq = jnp.sum(b * b, axis=-1, keepdims=True)           # (tn, 1)
    # fold `* scale` into the small (tb, D) operand instead of the (tb, tn) tile
    a_n = a * (SCALE * jax.lax.rsqrt(jnp.maximum(a_sq, 1e-24)))
    b_n = b * jax.lax.rsqrt(jnp.maximum(b_sq, 1e-24))
    # TODO(synk): if embeddings arrive as bf16, feed raw bf16 operands to the
    # MXU and apply inv-norm row/column scaling on the f32 scores instead.

    # scores tile: contract over D (last/lane dim of BOTH) -> no b transpose.
    s = jax.lax.dot_general(a_n, b_n, (((1,), (1,)), ((), ())),
                            preferred_element_type=jnp.float32)   # (tb, tn)

    @pl.when(j == 0)
    def _init():
        m_sc[...] = jnp.full_like(m_sc, -jnp.inf)
        l_sc[...] = jnp.zeros_like(l_sc)
        d_sc[...] = jnp.zeros_like(d_sc)

    # online logsumexp over the N axis
    m_prev = m_sc[...]
    m_new = jnp.maximum(m_prev, jnp.max(s, axis=-1, keepdims=True))
    l_sc[...] = (jnp.exp(m_prev - m_new) * l_sc[...]
                 + jnp.sum(jnp.exp(s - m_new), axis=-1, keepdims=True))
    m_sc[...] = m_new

    # Diagonal (positive) scores: labels == arange(B) and the positives are
    # the first B rows of embeddings_b, so with tb == tn they sit in N-block
    # j == i.  Row-wise dot (O(tb*D)) instead of an iota/mask over (tb, tn).
    @pl.when(j == i)
    def _diag():
        d_sc[...] = jnp.sum(a_n * b_n, axis=-1, keepdims=True)    # (tb, 1)

    @pl.when(j == nj - 1)
    def _finalize():
        lse = m_sc[...] + jnp.log(l_sc[...])                      # (tb, 1)
        mnr_partial = jnp.sum(lse - d_sc[...])                    # scalar

        # hyper loss: MSE(cosine_similarity(a, centers), 1); torch eps=1e-8
        # on the norm product == 1e-16 clamp on the squared-norm product.
        c = c_ref[...].astype(jnp.float32)                        # (tb, D)
        dot_ac = jnp.sum(a * c, axis=-1, keepdims=True)
        c_sq = jnp.sum(c * c, axis=-1, keepdims=True)
        cos_ac = dot_ac * jax.lax.rsqrt(jnp.maximum(a_sq * c_sq, 1e-16))
        hyp_partial = jnp.sum((cos_ac - 1.0) ** 2)

        mnr_ref[...] = jnp.broadcast_to(mnr_partial,
                                        mnr_ref.shape).astype(jnp.float32)
        hyp_ref[...] = jnp.broadcast_to(hyp_partial,
                                        hyp_ref.shape).astype(jnp.float32)


def _pick_tile(b_rows, n_rows):
    for t in (512, 256, 128, 64, 32, 16, 8):
        if b_rows % t == 0 and n_rows % t == 0:
            return t
    raise ValueError(
        f"B={b_rows}, N={n_rows} need a common tile size that is a multiple of 8")


def mnr_hyper_loss(embeddings_a, embeddings_b, center_embeddings,
                   *, hyper_ratio=HYPER_RATIO, tile=None):
    B, D = embeddings_a.shape
    N, Db = embeddings_b.shape
    assert Db == D and center_embeddings.shape == (B, D)
    assert N >= B, "positives (first B rows of embeddings_b) must exist"

    t = _pick_tile(B, N) if tile is None else tile
    assert B % t == 0 and N % t == 0
    nb, nn = B // t, N // t

    mnr_part, hyp_part = pl.pallas_call(
        mnr_hyper_loss_kernel,
        out_shape=(jax.ShapeDtypeStruct((nb, 8, 128), jnp.float32),
                   jax.ShapeDtypeStruct((nb, 8, 128), jnp.float32)),
        grid_spec=pltpu.PrefetchScalarGridSpec(
            num_scalar_prefetch=0,
            grid=(nb, nn),                                   # reduction axis last
            in_specs=[
                pl.BlockSpec((t, D), lambda i, j: (i, 0)),   # anchors
                pl.BlockSpec((t, D), lambda i, j: (j, 0)),   # candidates
                pl.BlockSpec((t, D), lambda i, j: (i, 0)),   # event centers
            ],
            out_specs=[
                pl.BlockSpec((1, 8, 128), lambda i, j: (i, 0, 0)),
                pl.BlockSpec((1, 8, 128), lambda i, j: (i, 0, 0)),
            ],
            scratch_shapes=[pltpu.VMEM((t, 1), jnp.float32),    # running max
                            pltpu.VMEM((t, 1), jnp.float32),    # running sum-exp
                            pltpu.VMEM((t, 1), jnp.float32)],   # diag scores
        ),
        compiler_params=pltpu.CompilerParams(
            dimension_semantics=("parallel", "arbitrary")),
    )(embeddings_a, embeddings_b, center_embeddings)

    mnr_loss = jnp.sum(mnr_part[:, 0, 0]) / B
    hyper_loss = jnp.sum(hyp_part[:, 0, 0]) / B
    return mnr_loss + hyper_ratio * hyper_loss


def mnr_hyper_loss_ref(a, b, c):
    a = a.astype(jnp.float32)
    b = b.astype(jnp.float32)
    c = c.astype(jnp.float32)
    a_n = a / jnp.maximum(jnp.linalg.norm(a, axis=-1, keepdims=True), 1e-12)
    b_n = b / jnp.maximum(jnp.linalg.norm(b, axis=-1, keepdims=True), 1e-12)
    scores = (a_n @ b_n.T) * SCALE
    labels = jnp.arange(a.shape[0])
    lse = jax.scipy.special.logsumexp(scores, axis=-1)
    mnr = jnp.mean(lse - scores[jnp.arange(a.shape[0]), labels])
    cos = jnp.sum(a * c, axis=-1) / jnp.maximum(
        jnp.linalg.norm(a, axis=-1) * jnp.linalg.norm(c, axis=-1), 1e-8)
    hyper = jnp.mean((cos - 1.0) ** 2)
    return mnr + HYPER_RATIO * hyper


if __name__ == "__main__":
    # TODO(synk): the SentenceTransformer forward and the python-dict
    # log_to_event / event_center lookup are host-side and not Pallas-
    # expressible; embeddings and center embeddings are synthesized directly.
    B, N, D = 8, 16, 32   # anchors, concat(positives, negatives), embedding dim
    key = jax.random.PRNGKey(0)
    ka, kb, kc = jax.random.split(key, 3)
    embeddings_a = jax.random.normal(ka, (B, D), dtype=jnp.float32)
    embeddings_b = jax.random.normal(kb, (N, D), dtype=jnp.float32)
    # make positives (first B rows of b) correlated with anchors, as in training
    embeddings_b = embeddings_b.at[:B].set(
        embeddings_a + 0.1 * jax.random.normal(kb, (B, D), dtype=jnp.float32))
    center_embeddings = embeddings_a + 0.05 * jax.random.normal(
        kc, (B, D), dtype=jnp.float32)

    loss = jax.block_until_ready(
        mnr_hyper_loss(embeddings_a, embeddings_b, center_embeddings))
    ref = mnr_hyper_loss_ref(embeddings_a, embeddings_b, center_embeddings)
    assert jnp.allclose(loss, ref, rtol=2e-5, atol=2e-5), (loss, ref)

    # second check: multiple anchor blocks + multiple candidate blocks
    # (exercises the parallel B axis, the diag tile j == i for i > 0, and the
    # online logsumexp across several N tiles).
    B2, N2 = 16, 48
    k2a, k2b, k2c = jax.random.split(jax.random.PRNGKey(0), 3)
    a2 = jax.random.normal(k2a, (B2, D), dtype=jnp.float32)
    b2 = jax.random.normal(k2b, (N2, D), dtype=jnp.float32)
    b2 = b2.at[:B2].set(a2 + 0.1 * jax.random.normal(k2b, (B2, D), jnp.float32))
    c2 = a2 + 0.05 * jax.random.normal(k2c, (B2, D), dtype=jnp.float32)
    loss2 = jax.block_until_ready(mnr_hyper_loss(a2, b2, c2, tile=8))
    ref2 = mnr_hyper_loss_ref(a2, b2, c2)
    assert jnp.allclose(loss2, ref2, rtol=2e-5, atol=2e-5), (loss2, ref2)

    print("KERNEL_OK")
</pallas_src>

<mosaic_0001>
module attributes {stable_mosaic.version = 11 : i64} {
  func.func @mnr_hyper_loss_kernel(%arg0: i32, %arg1: i32, %arg2: memref<8x32xf32, #tpu.memory_space<vmem>>, %arg3: memref<8x32xf32, #tpu.memory_space<vmem>>, %arg4: memref<8x32xf32, #tpu.memory_space<vmem>>, %arg5: memref<1x8x128xf32, #tpu.memory_space<vmem>>, %arg6: memref<1x8x128xf32, #tpu.memory_space<vmem>>, %arg7: memref<8x1xf32, #tpu.memory_space<vmem>>, %arg8: memref<8x1xf32, #tpu.memory_space<vmem>>, %arg9: memref<8x1xf32, #tpu.memory_space<vmem>>) attributes {dimension_semantics = [#tpu.dimension_semantics<parallel>, #tpu.dimension_semantics<arbitrary>], iteration_bounds = array<i64: 1, 2>, scalar_prefetch = 0 : i64, scratch_operands = 3 : i64, tpu.core_type = #tpu.core_type<tc>, window_params = [{transform_indices = @transform_0, window_bounds = array<i64: 8, 32>}, {transform_indices = @transform_1, window_bounds = array<i64: 8, 32>}, {transform_indices = @transform_2, window_bounds = array<i64: 8, 32>}, {transform_indices = @transform_3, window_bounds = array<i64: 1, 8, 128>}, {transform_indices = @transform_4, window_bounds = array<i64: 1, 8, 128>}]} {
    %c0 = arith.constant 0 : index
    %c0_0 = arith.constant 0 : index
    %0 = vector.load %arg2[%c0, %c0_0] : memref<8x32xf32, #tpu.memory_space<vmem>>, vector<8x32xf32>
    %c0_1 = arith.constant 0 : index
    %c0_2 = arith.constant 0 : index
    %1 = vector.load %arg3[%c0_1, %c0_2] : memref<8x32xf32, #tpu.memory_space<vmem>>, vector<8x32xf32>
    %2 = arith.mulf %0, %0 : vector<8x32xf32>
    %cst = arith.constant dense<0.000000e+00> : vector<8xf32>
    %3 = vector.multi_reduction <add>, %2, %cst [1] : vector<8x32xf32> to vector<8xf32>
    %4 = vector.shape_cast %3 : vector<8xf32> to vector<8x1xf32>
    %5 = arith.mulf %1, %1 : vector<8x32xf32>
    %cst_3 = arith.constant dense<0.000000e+00> : vector<8xf32>
    %6 = vector.multi_reduction <add>, %5, %cst_3 [1] : vector<8x32xf32> to vector<8xf32>
    %7 = vector.shape_cast %6 : vector<8xf32> to vector<8x1xf32>
    %cst_4 = arith.constant 1.000000e-24 : f32
    %8 = vector.broadcast %cst_4 : f32 to vector<8x1xf32>
    %9 = arith.maximumf %4, %8 : vector<8x1xf32>
    %10 = math.rsqrt %9 : vector<8x1xf32>
    %cst_5 = arith.constant 2.000000e+01 : f32
    %11 = vector.broadcast %cst_5 : f32 to vector<8x1xf32>
    %12 = arith.mulf %11, %10 : vector<8x1xf32>
    %13 = vector.broadcast %12 : vector<8x1xf32> to vector<8x32xf32>
    %14 = arith.mulf %0, %13 : vector<8x32xf32>
    %cst_6 = arith.constant 1.000000e-24 : f32
    %15 = vector.broadcast %cst_6 : f32 to vector<8x1xf32>
    %16 = arith.maximumf %7, %15 : vector<8x1xf32>
    %17 = math.rsqrt %16 : vector<8x1xf32>
    %18 = vector.broadcast %17 : vector<8x1xf32> to vector<8x32xf32>
    %19 = arith.mulf %1, %18 : vector<8x32xf32>
    %cst_7 = arith.constant dense<0.000000e+00> : vector<8x8xf32>
    %20 = tpu.matmul %14, %19, %cst_7 {dimension_numbers = #tpu.dot_dimension_numbers<[1], [1], [0], [0], [0, 0, 1, 0], [], []>} : vector<8x32xf32>, vector<8x32xf32>, vector<8x8xf32> -> vector<8x8xf32>
    %c0_i32 = arith.constant 0 : i32
    %21 = arith.cmpi eq, %arg1, %c0_i32 : i32
    %22 = arith.extui %21 : i1 to i32
    %c0_i32_8 = arith.constant 0 : i32
    %23 = arith.cmpi ne, %22, %c0_i32_8 : i32
    scf.if %23 {
      %cst_21 = arith.constant 0xFF800000 : f32
      %46 = vector.broadcast %cst_21 : f32 to vector<8x1xf32>
      %c0_22 = arith.constant 0 : index
      %c0_23 = arith.constant 0 : index
      %47 = vector.load %arg7[%c0_22, %c0_23] : memref<8x1xf32, #tpu.memory_space<vmem>>, vector<8x1xf32>
      tpu.vector_store %arg7[%c0_22, %c0_23], %46 {strides = array<i32>} : memref<8x1xf32, #tpu.memory_space<vmem>>, vector<8x1xf32>,
      %cst_24 = arith.constant 0.000000e+00 : f32
      %48 = vector.broadcast %cst_24 : f32 to vector<8x1xf32>
      %c0_25 = arith.constant 0 : index
      %c0_26 = arith.constant 0 : index
      %49 = vector.load %arg8[%c0_25, %c0_26] : memref<8x1xf32, #tpu.memory_space<vmem>>, vector<8x1xf32>
      tpu.vector_store %arg8[%c0_25, %c0_26], %48 {strides = array<i32>} : memref<8x1xf32, #tpu.memory_space<vmem>>, vector<8x1xf32>,
      %cst_27 = arith.constant 0.000000e+00 : f32
      %50 = vector.broadcast %cst_27 : f32 to vector<8x1xf32>
      %c0_28 = arith.constant 0 : index
      %c0_29 = arith.constant 0 : index
      %51 = vector.load %arg9[%c0_28, %c0_29] : memref<8x1xf32, #tpu.memory_space<vmem>>, vector<8x1xf32>
      tpu.vector_store %arg9[%c0_28, %c0_29], %50 {strides = array<i32>} : memref<8x1xf32, #tpu.memory_space<vmem>>, vector<8x1xf32>,
    } else {
    }
    %c0_9 = arith.constant 0 : index
    %c0_10 = arith.constant 0 : index
    %24 = vector.load %arg7[%c0_9, %c0_10] : memref<8x1xf32, #tpu.memory_space<vmem>>, vector<8x1xf32>
    %cst_11 = arith.constant dense<0xFF800000> : vector<8xf32>
    %25 = vector.multi_reduction <maximumf>, %20, %cst_11 [1] : vector<8x8xf32> to vector<8xf32>
    %26 = vector.shape_cast %25 : vector<8xf32> to vector<8x1xf32>
    %27 = arith.maximumf %24, %26 : vector<8x1xf32>
    %28 = arith.subf %24, %27 : vector<8x1xf32>
    %29 = math.exp %28 : vector<8x1xf32>
    %c0_12 = arith.constant 0 : index
    %c0_13 = arith.constant 0 : index
    %30 = vector.load %arg8[%c0_12, %c0_13] : memref<8x1xf32, #tpu.memory_space<vmem>>, vector<8x1xf32>
    %31 = arith.mulf %29, %30 : vector<8x1xf32>
    %32 = vector.broadcast %27 : vector<8x1xf32> to vector<8x8xf32>
    %33 = arith.subf %20, %32 : vector<8x8xf32>
    %34 = math.exp %33 : vector<8x8xf32>
    %cst_14 = arith.constant dense<0.000000e+00> : vector<8xf32>
    %35 = vector.multi_reduction <add>, %34, %cst_14 [1] : vector<8x8xf32> to vector<8xf32>
    %36 = vector.shape_cast %35 : vector<8xf32> to vector<8x1xf32>
    %37 = arith.addf %31, %36 : vector<8x1xf32>
    %c0_15 = arith.constant 0 : index
    %c0_16 = arith.constant 0 : index
    %38 = vector.load %arg8[%c0_15, %c0_16] : memref<8x1xf32, #tpu.memory_space<vmem>>, vector<8x1xf32>
    tpu.vector_store %arg8[%c0_15, %c0_16], %37 {strides = array<i32>} : memref<8x1xf32, #tpu.memory_space<vmem>>, vector<8x1xf32>,
    %c0_17 = arith.constant 0 : index
    %c0_18 = arith.constant 0 : index
    %39 = vector.load %arg7[%c0_17, %c0_18] : memref<8x1xf32, #tpu.memory_space<vmem>>, vector<8x1xf32>
    tpu.vector_store %arg7[%c0_17, %c0_18], %27 {strides = array<i32>} : memref<8x1xf32, #tpu.memory_space<vmem>>, vector<8x1xf32>,
    %40 = arith.cmpi eq, %arg1, %arg0 : i32
    %41 = arith.extui %40 : i1 to i32
    %c0_i32_19 = arith.constant 0 : i32
    %42 = arith.cmpi ne, %41, %c0_i32_19 : i32
    scf.if %42 {
      %46 = arith.mulf %14, %19 : vector<8x32xf32>
      %cst_21 = arith.constant dense<0.000000e+00> : vector<8xf32>
      %47 = vector.multi_reduction <add>, %46, %cst_21 [1] : vector<8x32xf32> to vector<8xf32>
      %48 = vector.shape_cast %47 : vector<8xf32> to vector<8x1xf32>
      %c0_22 = arith.constant 0 : index
      %c0_23 = arith.constant 0 : index
      %49 = vector.load %arg9[%c0_22, %c0_23] : memref<8x1xf32, #tpu.memory_space<vmem>>, vector<8x1xf32>
      tpu.vector_store %arg9[%c0_22, %c0_23], %48 {strides = array<i32>} : memref<8x1xf32, #tpu.memory_space<vmem>>, vector<8x1xf32>,
    } else {
    }
    %c1_i32 = arith.constant 1 : i32
    %43 = arith.cmpi eq, %arg1, %c1_i32 : i32
    %44 = arith.extui %43 : i1 to i32
    %c0_i32_20 = arith.constant 0 : i32
    %45 = arith.cmpi ne, %44, %c0_i32_20 : i32
    scf.if %45 {
      %c0_21 = arith.constant 0 : index
      %c0_22 = arith.constant 0 : index
      %46 = vector.load %arg7[%c0_21, %c0_22] : memref<8x1xf32, #tpu.memory_space<vmem>>, vector<8x1xf32>
      %c0_23 = arith.constant 0 : index
      %c0_24 = arith.constant 0 : index
      %47 = vector.load %arg8[%c0_23, %c0_24] : memref<8x1xf32, #tpu.memory_space<vmem>>, vector<8x1xf32>
      %48 = math.log %47 : vector<8x1xf32>
      %49 = arith.addf %46, %48 : vector<8x1xf32>
      %c0_25 = arith.constant 0 : index
      %c0_26 = arith.constant 0 : index
      %50 = vector.load %arg9[%c0_25, %c0_26] : memref<8x1xf32, #tpu.memory_space<vmem>>, vector<8x1xf32>
      %51 = arith.subf %49, %50 : vector<8x1xf32>
      %52 = vector.shape_cast %51 : vector<8x1xf32> to vector<1x8x1xf32>
      %cst_27 = arith.constant dense<0.000000e+00> : vector<1xf32>
      %53 = vector.multi_reduction <add>, %52, %cst_27 [1, 2] : vector<1x8x1xf32> to vector<1xf32>
      %54 = vector.shape_cast %53 : vector<1xf32> to vector<1x1x1xf32>
      %55 = vector.extract %54[0, 0, 0] : f32 from vector<1x1x1xf32>
      %c0_28 = arith.constant 0 : index
      %c0_29 = arith.constant 0 : index
      %56 = vector.load %arg4[%c0_28, %c0_29] : memref<8x32xf32, #tpu.memory_space<vmem>>, vector<8x32xf32>
      %57 = arith.mulf %0, %56 : vector<8x32xf32>
      %cst_30 = arith.constant dense<0.000000e+00> : vector<8xf32>
      %58 = vector.multi_reduction <add>, %57, %cst_30 [1] : vector<8x32xf32> to vector<8xf32>
      %59 = vector.shape_cast %58 : vector<8xf32> to vector<8x1xf32>
      %60 = arith.mulf %56, %56 : vector<8x32xf32>
      %cst_31 = arith.constant dense<0.000000e+00> : vector<8xf32>
      %61 = vector.multi_reduction <add>, %60, %cst_31 [1] : vector<8x32xf32> to vector<8xf32>
      %62 = vector.shape_cast %61 : vector<8xf32> to vector<8x1xf32>
      %63 = arith.mulf %4, %62 : vector<8x1xf32>
      %cst_32 = arith.constant 1.000000e-16 : f32
      %64 = vector.broadcast %cst_32 : f32 to vector<8x1xf32>
      %65 = arith.maximumf %63, %64 : vector<8x1xf32>
      %66 = math.rsqrt %65 : vector<8x1xf32>
      %67 = arith.mulf %59, %66 : vector<8x1xf32>
      %cst_33 = arith.constant 1.000000e+00 : f32
      %68 = vector.broadcast %cst_33 : f32 to vector<8x1xf32>
      %69 = arith.subf %67, %68 : vector<8x1xf32>
      %70 = arith.mulf %69, %69 : vector<8x1xf32>
      %71 = vector.shape_cast %70 : vector<8x1xf32> to vector<1x8x1xf32>
      %cst_34 = arith.constant dense<0.000000e+00> : vector<1xf32>
      %72 = vector.multi_reduction <add>, %71, %cst_34 [1, 2] : vector<1x8x1xf32> to vector<1xf32>
      %73 = vector.shape_cast %72 : vector<1xf32> to vector<1x1x1xf32>
      %74 = vector.extract %73[0, 0, 0] : f32 from vector<1x1x1xf32>
      %75 = vector.broadcast %55 : f32 to vector<1x8x128xf32>
      %c0_35 = arith.constant 0 : index
      %c0_36 = arith.constant 0 : index
      %c0_37 = arith.constant 0 : index
      %76 = vector.load %arg5[%c0_35, %c0_36, %c0_37] : memref<1x8x128xf32, #tpu.memory_space<vmem>>, vector<1x8x128xf32>
      tpu.vector_store %arg5[%c0_35, %c0_36, %c0_37], %75 {strides = array<i32>} : memref<1x8x128xf32, #tpu.memory_space<vmem>>, vector<1x8x128xf32>,
      %77 = vector.broadcast %74 : f32 to vector<1x8x128xf32>
      %c0_38 = arith.constant 0 : index
      %c0_39 = arith.constant 0 : index
      %c0_40 = arith.constant 0 : index
      %78 = vector.load %arg6[%c0_38, %c0_39, %c0_40] : memref<1x8x128xf32, #tpu.memory_space<vmem>>, vector<1x8x128xf32>
      tpu.vector_store %arg6[%c0_38, %c0_39, %c0_40], %77 {strides = array<i32>} : memref<1x8x128xf32, #tpu.memory_space<vmem>>, vector<1x8x128xf32>,
    } else {
    }
    return
  }
  func.func @transform_0(%arg0: i32, %arg1: i32) -> (i32, i32) {
    %c0_i32 = arith.constant 0 : i32
    %c0_i32_0 = arith.constant 0 : i32
    return %arg0, %c0_i32 : i32, i32
  }
  func.func @transform_1(%arg0: i32, %arg1: i32) -> (i32, i32) {
    %c0_i32 = arith.constant 0 : i32
    %c0_i32_0 = arith.constant 0 : i32
    return %arg1, %c0_i32 : i32, i32
  }
  func.func @transform_2(%arg0: i32, %arg1: i32) -> (i32, i32) {
    %c0_i32 = arith.constant 0 : i32
    %c0_i32_0 = arith.constant 0 : i32
    return %arg0, %c0_i32 : i32, i32
  }
  func.func @transform_3(%arg0: i32, %arg1: i32) -> (i32, i32, i32) {
    %c0_i32 = arith.constant 0 : i32
    %c0_i32_0 = arith.constant 0 : i32
    %c0_i32_1 = arith.constant 0 : i32
    return %arg0, %c0_i32, %c0_i32_0 : i32, i32, i32
  }
  func.func @transform_4(%arg0: i32, %arg1: i32) -> (i32, i32, i32) {
    %c0_i32 = arith.constant 0 : i32
    %c0_i32_0 = arith.constant 0 : i32
    %c0_i32_1 = arith.constant 0 : i32
    return %arg0, %c0_i32, %c0_i32_0 : i32, i32, i32
  }
}

</mosaic_0001>

<bundles_post_ra>
// kernel: tpu_custom_call.1
= control target key start
LH: loop header
LB: loop body
LE: loop exit
PB: predicated region body
PF: predicated region fallthrough
CT: control target
= control target key end

     0   :  { %10 = vsyncpa [#allocation6], 0  ;;  %s1224_s0 = inlined_call_operand.hbm [shape: f32[8,32], index: 0, kind: input, shape index: {}]   ;;  %s1225_s1 = inlined_call_operand.hbm [shape: f32[16,32], index: 1, kind: input, shape index: {}]   ;;  %s1226_s2 = inlined_call_operand.hbm [shape: f32[8,32], index: 2, kind: input, shape index: {}]   ;;  %s1227_s3 = inlined_call_operand.hbm [shape: f32[1,8,128], index: 3, kind: output, shape index: {0}]   ;;  %s1228_s4 = inlined_call_operand.hbm [shape: f32[1,8,128], index: 4, kind: output, shape index: {1}]  }
   0x1   :  { %11 = vsyncpa [#allocation9], 0 }
   0x2   :  { %13 = vsyncpa [#allocation9 + $0x1], 0 }
   0x3   :  { %14 = vsyncpa [#allocation7], 0 }
   0x4   :  { %15 = vsyncpa [#allocation13], 0  ;;  %s952_s15 = smov 0   ;;  %s954_s16 = smov 0  }
   0x5   :  { %s956_s17 = smov 0   ;;  %s958_s18 = smov 0  }
   0x6   :  { %s960_s19 = smov 0   ;;  %s962_s20 = smov 0  }
   0x7 LB: > { %s981_s21 = sadd.s32 4294967295, %s915_s20   ;;  %p79_p0 = scmp.ne.s32.totalorder %s899_s16, %s895_s15  ;;  %s915_s20 = sphi %s962_s20, %s21_s20   ;;  %s911_s19 = sphi %s960_s19, %s1246_s19   ;;  %s907_s18 = sphi %s958_s18, %s1245_s18   ;;  %s903_s17 = sphi %s956_s17, %s1244_s17   ;;  %s899_s16 = sphi %s954_s16, %s1243_s16   ;;  %s895_s15 = sphi %s952_s15, %s1242_s15  }
   0x8   : > { %p1229_p1 = scmp.eq.s32.totalorder %s981_s21, 0  ;;  %p570_p2 = scmp.ge.s32.totalorder %s915_s20, 1 }
   0x9   : > { %p168_p3 = scmp.lt.s32.totalorder %s915_s20, 3  ;;  %s917_s24 = smov [#allocation10]  }
   0xa   : > { %p989_p4 = por %p1229_p1, %p79_p0  ;;  %s196_s25 = sshll.u32 %s917_s24, 4  ;;  %s197_s25 = int_to_ptr.vmem [resolvable:$true] %s196_s25 }
   0xb   : > { %p993_p5 = pnand %p570_p2, %p168_p3  ;;  %s918_s27 = smov [#allocation5]  }
   0xc   : > { %s1232_s22 = scalar_select %p989_p4, 1, 0 }
   0xd   : > { %s1233_s23 = scalar_select %p993_p5, 1, 0 }
   0xe   : > { %p621_p6 = pneg %p993_p5  ;;  %s183_s28 = sshll.u32 %s918_s27, 4  ;;  %s1005_s28 = int_to_ptr.vmem [resolvable:$true] %s183_s28 }
   0xf   : > { %s711_s5 = scalar_lea.hbm %s1226_s2, 128 }
  0x10   : > { %p1001_p7 = pnand %p621_p6, %p1229_p1  ;;  %p712_p8 = scmp.ne.s32.totalorder %s1226_s2, %s711_s5 }
  0x11   : > { %p718_p12 = scmp.lt.u32.totalorder %s711_s5, %s1226_s2 }
  0x12   : > { %p713_p9 = pneg %p1001_p7 }
  0x14   : > { %p714_p10 = pnand %p713_p9, %p712_p8 }
  0x16   : > { %p715_p11 = pneg %p714_p10 }
  0x18   : > { %p720_p13 = pnand %p718_p12, %p715_p11 }
  0x1a   : > { %723 = shalt.err (!%p720_p13)
}
  0x1b   : > { %s724_s10 = scalar_lea.vmem %s197_s25, 128  ;;  %p732_p6 = scmp.lt.s32.totalorder %s197_s25, %s197_s25 }
  0x1c   : > { %p725_p0 = scmp.ne.s32.totalorder %s197_s25, %s724_s10  ;;  %p733_p1 = scmp.lt.s32.totalorder %s724_s10, %s724_s10 }
  0x1e   : > { %p727_p2 = pnand %p725_p0, %p713_p9  ;;  %p734_p4 = por %p733_p1, %p732_p6 }
  0x20   : > { %p728_p3 = pneg %p727_p2 }
  0x22   : > { %p735_p5 = pnand %p734_p4, %p728_p3 }
  0x24   : > { %738 = shalt.err (!%p735_p5)
}
  0x25   : > { %627 = dma.hbm_to_vmem [thread:$0]  (!%p1001_p7), %s1226_s2, 128, %s197_s25, [#allocation9]  }
  0x26   : > { %s739_s15 = scalar_lea.hbm %s1224_s0, 128 }
  0x27   : > { %p740_p8 = scmp.ne.s32.totalorder %s1224_s0, %s739_s15  ;;  %p746_p5 = scmp.lt.u32.totalorder %s739_s15, %s1224_s0 }
  0x29   : > { %p742_p1 = pnand %p740_p8, %p713_p9 }
  0x2b   : > { %p743_p4 = pneg %p742_p1 }
  0x2d   : > { %p748_p10 = pnand %p746_p5, %p743_p4 }
  0x2f   : > { %751 = shalt.err (!%p748_p10)
}
  0x30   : > { %s752_s25 = scalar_lea.vmem %s1005_s28, 128  ;;  %p760_p0 = scmp.lt.s32.totalorder %s1005_s28, %s1005_s28 }
  0x31   : > { %p753_p11 = scmp.ne.s32.totalorder %s1005_s28, %s752_s25  ;;  %p761_p2 = scmp.lt.s32.totalorder %s752_s25, %s752_s25 }
  0x33   : > { %p755_p12 = pnand %p753_p11, %p713_p9  ;;  %p762_p3 = por %p761_p2, %p760_p0 }
  0x35   : > { %p756_p13 = pneg %p755_p12 }
  0x37   : > { %p763_p6 = pnand %p762_p3, %p756_p13 }
  0x39   : > { %766 = shalt.err (!%p763_p6)
}
  0x3a   : > { %624 = dma.hbm_to_vmem [thread:$0]  (!%p1001_p7), %s1224_s0, 128, %s1005_s28, [#allocation6]  }
  0x3b   : > { %s30_s7 = sadd.s32 1, %s911_s19  ;;  %s66_s8 = sadd.s32 1, %s903_s17 }
  0x3c   : > { %p31_p9 = scmp.ge.s32.totalorder %s30_s7, 2  ;;  %p73_p8 = scmp.ne.s32.totalorder %s903_s17, %s899_s16 }
  0x3d   : > { %p74_p1 = scmp.eq.s32.totalorder %s915_s20, 0  ;;  %p634_p4 = scmp.lt.s32.totalorder %s915_s20, 2 }
  0x3e   : > { %s1248_s7 = smov (%p31_p9, %s30_s7), 0  ;;  %s207_s26 = sand.u32 1, %s915_s20  }
  0x3f   : > { %p75_p5 = por %p74_p1, %p73_p8  ;;  %s63_s9 = ssub.s32 %s911_s19, %s1248_s7 }
  0x40   : > { %p64_p10 = scmp.eq.s32.totalorder %s63_s9, 0  ;;  %s209_s10 = sand.u32 1, %s903_s17  }
  0x41   : > { %s574_s11 = sshll.u32 %s209_s10, 3  ;;  %s575_s12 = sshll.u32 %s911_s19, 7 }
  0x42   : > { %s1068_s13 = scalar_select %p64_p10, %s903_s17, %s66_s8  }
  0x43   : > { %s1073_s15 = scalar_lea.hbm %s1225_s1, %s575_s12  ;;  %s211_s24 = scalar_lea.vmem [#allocation8], %s574_s11 }
  0x44   : > { %s218_s27 = sshll.u32 %s211_s24, 4  ;;  %p1077_p7 = pnand %p634_p4, %p75_p5  ;;  %s1081_s27 = int_to_ptr.vmem [resolvable:$true] %s218_s27 }
  0x45   : > { %s208_s30 = scalar_lea.sflag [#allocation9], %s207_s26  ;;  %s767_s25 = scalar_lea.hbm %s1073_s15, 128 }
  0x46   : > { %p768_p11 = scmp.ne.s32.totalorder %s1073_s15, %s767_s25  ;;  %p769_p12 = pneg %p1077_p7 }
  0x47   : > { %s772_s8 = scalar_lea.hbm %s1225_s1, 256  ;;  %p773_p2 = scmp.lt.u32.totalorder %s1073_s15, %s1225_s1 }
  0x48   : > { %p770_p13 = pnand %p769_p12, %p768_p11  ;;  %p774_p3 = scmp.lt.u32.totalorder %s772_s8, %s767_s25 }
  0x49   : > { %p776_p9 = scmp.lt.u32.totalorder %s767_s25, %s1073_s15 }
  0x4a   : > { %p771_p0 = pneg %p770_p13  ;;  %p775_p6 = por %p774_p3, %p773_p2 }
  0x4c   : > { %p777_p8 = por %p776_p9, %p775_p6 }
  0x4e   : > { %p778_p1 = pnand %p777_p8, %p771_p0 }
  0x50   : > { %781 = shalt.err (!%p778_p1)
}
  0x51   : > { %s782_s26 = scalar_lea.vmem %s1081_s27, 128  ;;  %s919_s11 = smov [#allocation8]  }
  0x52   : > { %p783_p4 = scmp.ne.s32.totalorder %s1081_s27, %s782_s26  ;;  %s787_s12 = sshll.u32 %s919_s11, 4  ;;  %s788_s12 = int_to_ptr.vmem [resolvable:$false] %s787_s12 }
  0x53   : > { %s789_s28 = scalar_lea.vmem %s788_s12, 256  ;;  %p790_p11 = scmp.lt.s32.totalorder %s1081_s27, %s788_s12 }
  0x54   : > { %p785_p5 = pnand %p783_p4, %p769_p12  ;;  %p791_p13 = scmp.lt.s32.totalorder %s789_s28, %s782_s26 }
  0x56   : > { %p786_p10 = pneg %p785_p5  ;;  %p792_p2 = por %p791_p13, %p790_p11 }
  0x58   : > { %p793_p3 = pnand %p792_p2, %p786_p10 }
  0x5a   : > { %796 = shalt.err (!%p793_p3)
}
  0x5b   : > { %631 = dma.hbm_to_vmem [thread:$0]  (!%p1077_p7), %s1073_s15, 128, %s1081_s27, %s208_s30  }
  0x5c   : > { %p1236_p0 = scmp.ne.s32.totalorder %s1233_s23, 0 }
  0x5d   : > { %p1237_p12 = scmp.eq.s32.totalorder (!%p1236_p0), %s981_s21, 0 }
  0x5e   : > { %227 = sbr.rel (%p1236_p0) target bundleno = 1348 (0x544), region = 32 }
  0x65   : > { %874 = dma.done.wait (%p1237_p12), [#allocation6], 128   ;;  %p1238_p6 = pmov %p1237_p12 }
  0x66   : > { %s233_s14 = sand.u32 1, %s981_s21   ;;  %s235_s24 = sand.u32 1, %s899_s16  }
  0x67   : > { %876 = vsyncadd (%p1238_p6), [#allocation6], 4294967168  ;;  %s578_s25 = sshll.u32 %s235_s24, 3  ;;  %s234_s5 = scalar_lea.sflag [#allocation9], %s233_s14 }
  0x68   : > { %s237_s29 = scalar_lea.vmem [#allocation8], %s578_s25  ;;  %p1239_p9 = scmp.ne.s32.totalorder %s1232_s22, 0 }
  0x6a   : > { %878 = dma.done.wait (%p1239_p9), %s234_s5, 128  }
  0x6b   : > { %880 = vsyncadd (%p1239_p9), %s234_s5, 4294967168  ;;  %p1240_p7 = pmov %p1238_p6 }
  0x6c   : > { %p1241_p8 = pmov %p1238_p6 }
  0x6d   : > { %882 = dma.done.wait (%p1240_p7), [#allocation9], 128  }
  0x6e   : > { %884 = vsyncadd (%p1241_p8), [#allocation9], 4294967168  ;;  %v262_v0 = vld [vmem:[%s237_s29] sm:$0xff]  ;;  %vm264_vm0 = vcmask 261120   ;;  %v1124_v1 = vld [vmem:[#allocation5] sm:$0xff]  ;;  %v920_v6 = vmov 0.0  }
  0x6f   : > { %v268_v2 = vmul.f32 %v262_v0, %v262_v0  ;;  %v263_v3 = vmul.f32 %v1124_v1, %v1124_v1  ;;  %594 = vmatprep.subr.mxu0 %v920_v6  ;;  %vm921_vm1 = vmmov 0   ;;  %p582_p1 = scmp.ne.s32.totalorder %s907_s18, 0 }
  0x70   : > { %596 = vmatprep.mubr.msk.f32.mxu0 %vm921_vm1, %v920_v6  ;;  %vm359_vm2 = vcmask (!%p582_p1), 7168   ;;  %v922_v18 = vmov (!%p582_p1), -inf   ;;  %v923_v19 = vmov (!%p582_p1), 0.0  }
  0x71   : > { %v269_v4 = vsel %vm264_vm0, %v268_v2, 0.0  ;;  %v265_v5 = vsel %vm264_vm0, %v263_v3, 0.0  ;;  %360 = vst.msk [vmem:[#allocation2] sm:$0xff] (!%p582_p1), %vm359_vm2, %v922_v18  ;;  %361 = vst.msk [vmem:[#allocation3] sm:$0xff] (!%p582_p1), %vm359_vm2, %v923_v19 }
  0x72   : > { %270 = vadd.xlane.f32.xlu0 %v269_v4  ;;  %362 = vst.msk [vmem:[#allocation4] sm:$0xff] (!%p582_p1), %vm359_vm2, %v923_v19 }
  0x76   : > { %266 = vadd.xlane.f32.xlu0 %v265_v5 }
  0xff   : > { %v271_v7 = vpop.xlane.xlu0 %270 }
 0x100   : > { %v276_v8 = vmax.f32 %v271_v7, 1e-24 }
 0x102   : > { %698 = vrsqrt.f32 %v276_v8 }
 0x103   : > { %v1130_v9 = vpop.xlane.xlu0 %266 }
 0x104   : > { %v272_v10 = vmax.f32 %v1130_v9, 1e-24 }
 0x106   : > { %700 = vrsqrt.f32 %v272_v10 }
 0x10c   : > { %v699_v11 = vpop.eup %698 }
 0x10d   : > { %v278_v12 = vmul.f32 %v699_v11, %v262_v0 }
 0x10f   : > { %595 = vmatpush3.xpose.msk.msra.mxu0 %vm264_vm0, %v278_v12 }
 0x110   : > { %v701_v13 = vpop.eup %700 }
 0x111   : > { %v274_v14 = vmul.f32 20.0, %v701_v13 }
 0x113   : > { %v275_v15 = vmul.f32 %v274_v14, %v1124_v1 }
 0x115   : > { %597 = vmatmul.mubr.msk.f32.vlgmr.msra.gmra.mrb[0].mxu0 %vm264_vm0, %v275_v15 }
 0x1e3   : > { %358 = sbr.rel (%p582_p1) target bundleno = 490 (0x1ea), region = 48 }
 0x1e8   : > { %v351_v16 = vpop.f32.mrb[0].mxu0 }
 0x1e9   : > { %v598_v17 = vpop.f32.mrb[1].mxu0 }
 0x1ea PF: > { %vm364_vm3 = vcmask 64512   ;;  %v924_v21 = vmov 0   ;;  %v363_v22 = vld [vmem:[#allocation2] sm:$0xff]  ;;  %vm386_vm4 = vcmask 7168   ;;  %v372_v33 = vld [vmem:[#allocation3] sm:$0xff]  ;;  %v393_v37 = vmul.f32 (!%p582_p1), %v278_v12, %v275_v15 }
 0x1eb   : > { %v365_v20 = vsel %vm364_vm3, %v351_v16, -inf  ;;  %702 = vset.pattern.permute.xlu0 %v924_v21 }
 0x1ec   : > { %366 = vmax.xlane.f32.xlu0 %v365_v20  ;;  %v394_v38 = vsel (!%p582_p1), %vm264_vm0, %v393_v37, 0.0 }
 0x279   : > { %v367_v23 = vpop.xlane.xlu0 %366 }
 0x27a   : > { %v368_v24 = vmax.f32 %v363_v22, %v367_v23 }
 0x27c   : > { %v369_v25 = vsub.f32 %v363_v22, %v368_v24  ;;  %388 = vst.msk [vmem:[#allocation2] sm:$0xff] %vm386_vm4, %v368_v24  ;;  %376 = vperm.xlu0 %702, %v368_v24  }
 0x27e   : > { %v370_v31 = vmul.f32 1.442695, %v369_v25 }
 0x29b   : > { %395 = vadd.xlane.f32.xlu0 (!%p582_p1), %v394_v38 }
 0x2fb   : > { %v377_v26 = vpop.permute.xlu0 %376 }
 0x2fc   : > { %v379_v27 = vsub.f32 %v351_v16, %v377_v26 }
 0x2fe   : > { %v380_v28 = vmul.f32 1.442695, %v379_v27 }
 0x300   : > { %703 = vpow2.f32 %v380_v28 }
 0x301   : > { %705 = vpow2.f32 %v370_v31 }
 0x30a   : > { %v704_v29 = vpop.eup %703 }
 0x30b   : > { %v382_v30 = vsel %vm364_vm3, %v704_v29, 0.0  ;;  %v706_v32 = vpop.eup %705 }
 0x30c   : > { %383 = vadd.xlane.f32.xlu1 %v382_v30  ;;  %v373_v34 = vmul.f32 %v706_v32, %v372_v33 }
 0x328   : > { %v396_v39 = vpop.xlane.xlu0 (!%p582_p1), %395 }
 0x329   : > { %397 = vst.msk [vmem:[#allocation4] sm:$0xff] (!%p582_p1), %vm386_vm4, %v396_v39 }
 0x396   : > { %392 = sbr.rel (%p582_p1) target bundleno = 925 (0x39d), region = 52 }
 0x399   : > { %v384_v35 = vpop.xlane.xlu1 %383 }
 0x39a   : > { %v385_v36 = vadd.f32 %v384_v35, %v373_v34 }
 0x39c   : > { %387 = vst.msk [vmem:[#allocation3] sm:$0xff] %vm386_vm4, %v385_v36 }
 0x39d PF: > { %p584_p4 = scmp.ne.s32.totalorder %s907_s18, 1 }
 0x39e   : > { %v419_v40 = vld [vmem:[#allocation10] sm:$0xff] (!%p584_p4)  ;;  %v402_v47 = vld [vmem:[#allocation2] sm:$0xff] (!%p584_p4) }
 0x39f   : > { %401 = sbr.rel (%p584_p4) target bundleno = 1300 (0x514), region = 56  ;;  %v424_v41 = vmul.f32 (!%p584_p4), %v419_v40, %v419_v40  ;;  %v420_v42 = vmul.f32 (!%p584_p4), %v419_v40, %v1124_v1  ;;  %v407_v49 = vld [vmem:[#allocation4] sm:$0xff] (!%p584_p4) }
 0x3a1   : > { %v425_v43 = vsel (!%p584_p4), %vm264_vm0, %v424_v41, 0.0  ;;  %v421_v44 = vsel (!%p584_p4), %vm264_vm0, %v420_v42, 0.0 }
 0x3a2   : > { %426 = vadd.xlane.f32.xlu0 (!%p584_p4), %v425_v43 }
 0x3a3   : > { %v403_v45 = vld [vmem:[#allocation3] sm:$0xff] (!%p584_p4) }
 0x3a4   : > { %707 = vlog2.f32 (!%p584_p4), %v403_v45 }
 0x3a6   : > { %422 = vadd.xlane.f32.xlu0 %v421_v44 }
 0x3ae   : > { %v708_v46 = vpop.eup %707 }
 0x3af   : > { %v405_v48 = vmul.f32 0.6931472, %v708_v46 }
 0x3b1   : > { %v406_v50 = vadd.f32 %v405_v48, %v402_v47 }
 0x3b3   : > { %v408_v51 = vsub.f32 %v406_v50, %v407_v49 }
 0x3b5   : > { %v409_v52 = vsel %vm386_vm4, %v408_v51, 0.0 }
 0x3b6   : > { %410 = vadd.xlane.f32.xlu1 %v409_v52 }
 0x42f   : > { %v427_v53 = vpop.xlane.xlu0 %426 }
 0x430   : > { %v428_v54 = vmul.f32 %v427_v53, %v1130_v9 }
 0x432   : > { %v429_v55 = vmax.f32 %v428_v54, 1e-16 }
 0x433   : > { %v423_v56 = vpop.xlane.xlu0 %422 }
 0x434   : > { %709 = vrsqrt.f32 %v429_v55 }
 0x43e   : > { %v710_v57 = vpop.eup %709 }
 0x43f   : > { %v431_v58 = vmul.f32 %v710_v57, %v423_v56 }
 0x441   : > { %v585_v59 = vadd.f32 -1.0, %v431_v58 }
 0x443   : > { %v433_v60 = vmul.f32 %v585_v59, %v585_v59  ;;  %v411_v62 = vpop.xlane.xlu1 %410 }
 0x444   : > { %v412_v63 = vrot.slane %v411_v62, 4 }
 0x445   : > { %v434_v61 = vsel %vm386_vm4, %v433_v60, 0.0 }
 0x446   : > { %435 = vadd.xlane.f32.xlu1 %v434_v61  ;;  %v413_v0 = vadd.f32 %v412_v63, %v411_v62 }
 0x448   : > { %v414_v1 = vrot.slane %v413_v0, 2 }
 0x44a   : > { %v415_v2 = vadd.f32 %v414_v1, %v413_v0 }
 0x44c   : > { %v416_v3 = vrot.slane %v415_v2, 1 }
 0x44e   : > { %v417_v4 = vadd.f32 %v416_v3, %v415_v2 }
 0x450   : > { %599 = vpush %v417_v4 }
 0x481   : > { %s600_s18 = spop %599 }
 0x482   : > { %v444_v5 = vstv %s600_s18 }
 0x483   : > { %445 = vst [vmem:[#allocation11] sm:$0xff] %v444_v5 }
 0x4d3   : > { %v436_v6 = vpop.xlane.xlu1 %435 }
 0x4d4   : > { %v437_v7 = vrot.slane %v436_v6, 4 }
 0x4d6   : > { %v438_v8 = vadd.f32 %v437_v7, %v436_v6 }
 0x4d8   : > { %v439_v9 = vrot.slane %v438_v8, 2 }
 0x4da   : > { %v440_v10 = vadd.f32 %v439_v9, %v438_v8 }
 0x4dc   : > { %v441_v11 = vrot.slane %v440_v10, 1 }
 0x4de   : > { %v442_v12 = vadd.f32 %v441_v11, %v440_v10 }
 0x4e0   : > { %601 = vpush %v442_v12 }
 0x511   : > { %s602_s22 = spop %601 }
 0x512   : > { %v446_v13 = vstv %s602_s22 }
 0x513   : > { %447 = vst [vmem:[#allocation12] sm:$0xff] %v446_v13 }
 0x514 PF: > { %p637_p5 = scmp.eq.s32.totalorder %s981_s21, 1  ;;  %s925_s23 = smov [#allocation11]  }
 0x515   : > { %s457_s15 = sshll.u32 %s925_s23, 4  ;;  %s926_s27 = smov [#allocation12]   ;;  %s458_s15 = int_to_ptr.vmem [resolvable:$true] %s457_s15 }
 0x516   : > { %s470_s30 = sshll.u32 %s926_s27, 4  ;;  %s797_s6 = scalar_lea.vmem %s458_s15, 128  ;;  %s1155_s30 = int_to_ptr.vmem [resolvable:$true] %s470_s30 }
 0x517   : > { %p798_p10 = scmp.ne.s32.totalorder %s458_s15, %s797_s6  ;;  %p804_p2 = scmp.lt.s32.totalorder %s458_s15, %s458_s15 }
 0x518   : > { %p805_p3 = scmp.lt.s32.totalorder %s797_s6, %s797_s6 }
 0x519   : > { %p799_p11 = pnand %p798_p10, %p637_p5 }
 0x51a   : > { %p806_p0 = por %p805_p3, %p804_p2 }
 0x51b   : > { %p800_p13 = pneg %p799_p11 }
 0x51d   : > { %p807_p12 = pnand %p806_p0, %p800_p13 }
 0x51f   : > { %810 = shalt.err (!%p807_p12)
}
 0x520   : > { %s811_s10 = scalar_lea.hbm %s1227_s3, 128 }
 0x521   : > { %p812_p6 = scmp.ne.s32.totalorder %s1227_s3, %s811_s10  ;;  %p817_p8 = scmp.lt.u32.totalorder %s811_s10, %s1227_s3 }
 0x523   : > { %p813_p9 = pnand %p812_p6, %p637_p5 }
 0x525   : > { %p814_p7 = pneg %p813_p9 }
 0x527   : > { %p819_p1 = pnand %p817_p8, %p814_p7 }
 0x529   : > { %822 = shalt.err (!%p819_p1)
}
 0x52a   : > { %614 = dma.vmem_to_hbm [thread:$0]  (%p637_p5), %s458_s15, 128, %s1227_s3, [#allocation7]  }
 0x52b   : > { %s823_s25 = scalar_lea.vmem %s1155_s30, 128  ;;  %p830_p13 = scmp.lt.s32.totalorder %s1155_s30, %s1155_s30 }
 0x52c   : > { %p824_p4 = scmp.ne.s32.totalorder %s1155_s30, %s823_s25  ;;  %p831_p2 = scmp.lt.s32.totalorder %s823_s25, %s823_s25 }
 0x52e   : > { %p825_p10 = pnand %p824_p4, %p637_p5  ;;  %p832_p3 = por %p831_p2, %p830_p13 }
 0x530   : > { %p826_p11 = pneg %p825_p10 }
 0x532   : > { %p833_p0 = pnand %p832_p3, %p826_p11 }
 0x534   : > { %836 = shalt.err (!%p833_p0)
}
 0x535   : > { %s837_s18 = scalar_lea.hbm %s1228_s4, 128 }
 0x536   : > { %p838_p12 = scmp.ne.s32.totalorder %s1228_s4, %s837_s18  ;;  %p843_p7 = scmp.lt.u32.totalorder %s837_s18, %s1228_s4 }
 0x538   : > { %p839_p6 = pnand %p838_p12, %p637_p5 }
 0x53a   : > { %p840_p9 = pneg %p839_p6 }
 0x53c   : > { %p845_p8 = pnand %p843_p7, %p840_p9 }
 0x53e   : > { %848 = shalt.err (!%p845_p8)
}
 0x53f   : > { %616 = dma.vmem_to_hbm [thread:$0]  (%p637_p5), %s1155_s30, 128, %s1228_s4, [#allocation13]  }
 0x540   : > { %886 = dma.done.wait (%p637_p5), [#allocation7], 128  }
 0x541   : > { %888 = vsyncadd (%p637_p5), [#allocation7], 4294967168 }
 0x542   : > { %890 = dma.done.wait (%p637_p5), [#allocation13], 128  }
 0x543   : > { %892 = vsyncadd (%p637_p5), [#allocation13], 4294967168 }
 0x544 PF: > { %s21_s20 = sadd.s32 1, %s915_s20   ;;  %s1242_s15 = smov %s899_s16 }
 0x545   : > { %p18_p1 = scmp.ge.s32.totalorder %s21_s20, 4   ;;  %s1243_s16 = smov %s903_s17 }
 0x546   : > { %s1244_s17 = smov %s1068_s13  ;;  %s1245_s18 = smov %s911_s19 }
 0x547   : > { %s1246_s19 = smov %s1248_s7  ;;  %20 = sbr.rel (!%p18_p1) target bundleno = 7 (0x7), region = 102 }
 0x54e   :  { %487 = vsyncpa [#allocation6], 1 }
 0x54f   :  { %489 = vsyncpa [#allocation6 + $0x1], 1 }
 0x550   :  { %490 = vsyncpa [#allocation9], 1 }
 0x551   :  { %492 = vsyncpa [#allocation9 + $0x1], 1 }
 0x552   :  { %493 = vsyncpa [#allocation7], 1 }
 0x553   :  { %495 = vsyncpa [#allocation7 + $0x1], 1 }
 0x554   :  { %496 = vsyncpa [#allocation13], 1 }

</bundles_post_ra>
